<compile_context>
chip_gen: v7x
topology: tpu7x:2x2x1
jax: 0.10.0
libtpu: 0.0.40
codegen_flags: <defaults>
</compile_context>

<pallas_src>
import functools
import math

import jax
import jax.numpy as jnp
from jax import lax
from jax.experimental import pallas as pl
from jax.experimental.pallas import tpu as pltpu

# ----- module hyperparameters (globals D, Dk, Dv, Nh in the reference code) --
D, Dk, Dv, Nh = 32, 8, 8, 4          # Dv * Nh == D (required by `head @ Wo`)
NEG_INF = -1e30


def _self_attention_kernel(xq_ref, xkv_ref, kmask_ref, qmask_ref,
                           wq_ref, wkv_ref, wot_ref,
                           o_ref,
                           q_scr, acc_scr, m_scr, l_scr,
                           *, compute_dtype):
    # xq_ref   : (D, Tq)          query-tile slice of x (channels-first)
    # xkv_ref  : (D, Tk)          kv-tile slice of x
    # kmask_ref: (1, Tk)          key mask for this kv tile
    # qmask_ref: (1, Tq)          query mask for this q tile
    # wq_ref   : (D, Nh*Dk)       fused per-head Wq, 1/sqrt(Dk) folded in
    # wkv_ref  : (Nh*(Dk+Dv), D)  fused [Wk^T ; Wv^T]
    # wot_ref  : (Dv*Nh, D)       Wo^T (contract over Wo's rows)
    # o_ref    : (D, Tq)          output tile, channels-first (lane-dense)
    ki = pl.program_id(2)
    nk = pl.num_programs(2)

    # ---- once per (batch, q-tile): project queries, reset running stats -----
    @pl.when(ki == 0)
    def _init():
        # Only sizeable in-kernel transpose: a (D, Tq) tile, once per q-tile,
        # amortized over all L/Tk kv steps.  After this every score matmul is
        # the natural (Tq, Dk) @ (Dk, Tk) MXU form with no per-step relayout.
        xq = jnp.transpose(xq_ref[...]).astype(compute_dtype)            # (Tq, D)
        q_scr[...] = jnp.dot(xq, wq_ref[...].astype(compute_dtype),
                             preferred_element_type=jnp.float32)          # (Tq, Nh*Dk)
        m_scr[...] = jnp.full(m_scr.shape, -jnp.inf, dtype=m_scr.dtype)
        l_scr[...] = jnp.zeros(l_scr.shape, dtype=l_scr.dtype)
        acc_scr[...] = jnp.zeros(acc_scr.shape, dtype=acc_scr.dtype)

    # ---- K/V projection for this kv tile (channels-first, no transposes) ----
    xkv = xkv_ref[...].astype(compute_dtype)                              # (D, Tk)
    kv = jnp.dot(wkv_ref[...].astype(compute_dtype), xkv,
                 preferred_element_type=jnp.float32)                      # (Nh*(Dk+Dv), Tk)

    kmask = kmask_ref[...]                                                # (1, Tk) f32
    kbias = (1.0 - kmask) * NEG_INF                                       # hoisted over heads
    v_base = Nh * Dk

    # Nh == 4 is static -> unrolled.  Each head's live temporary is one
    # (Tq, Tk) f32 score/prob tile; with Tq, Tk <= 512 a few of these coexist
    # comfortably in VMEM even if the scheduler interleaves heads.
    for h in range(Nh):
        q_h = q_scr[:, h * Dk:(h + 1) * Dk].astype(compute_dtype)         # (Tq, Dk)
        k_h = kv[h * Dk:(h + 1) * Dk, :].astype(compute_dtype)            # (Dk, Tk)
        v_h = kv[v_base + h * Dv:v_base + (h + 1) * Dv, :].astype(compute_dtype)

        s = jnp.dot(q_h, k_h, preferred_element_type=jnp.float32)         # (Tq, Tk)
        s = s * kmask + kbias                                             # mask_logits

        m_prev = m_scr[h]                                                 # (Tq, 1)
        m_cur = jnp.maximum(m_prev, jnp.max(s, axis=-1, keepdims=True))
        alpha = jnp.exp(m_prev - m_cur)                                   # (Tq, 1)
        p = jnp.exp(s - m_cur)                                            # (Tq, Tk) f32

        l_scr[h] = alpha * l_scr[h] + jnp.sum(p, axis=-1, keepdims=True)
        m_scr[h] = m_cur

        # Context kept in (Dv, Tq) layout (lane-dense accumulator): contract
        # the key axis of v_h and p (trans_b matmul, MXU-native).
        hv = lax.dot_general(v_h, p.astype(compute_dtype),
                             (((1,), (1,)), ((), ())),
                             preferred_element_type=jnp.float32)          # (Dv, Tq)
        alpha_row = jnp.swapaxes(alpha, 0, 1)                             # (1, Tq)
        acc_scr[h * Dv:(h + 1) * Dv, :] = (
            alpha_row * acc_scr[h * Dv:(h + 1) * Dv, :] + hv)

    # ---- last kv tile: normalize, apply query mask, one fused Wo matmul -----
    @pl.when(ki == nk - 1)
    def _finalize():
        qmask = qmask_ref[...]                                            # (1, Tq)
        parts = []
        for h in range(Nh):
            inv_l = pl.reciprocal(l_scr[h], approx=True)                  # (Tq, 1) -> EUP
            scale = jnp.swapaxes(inv_l, 0, 1) * qmask                     # (1, Tq)
            parts.append(acc_scr[h * Dv:(h + 1) * Dv, :] * scale)
        ctx = jnp.concatenate(parts, axis=0).astype(compute_dtype)        # (Nh*Dv, Tq)
        out = jnp.dot(wot_ref[...].astype(compute_dtype), ctx,
                      preferred_element_type=jnp.float32)                 # (D, Tq)
        o_ref[...] = out.astype(o_ref.dtype)                              # lane-dense store


def _pick_tile(L, cap):
    if L % 128 == 0:
        t = min(cap, L)
        while L % t:
            t -= 128
        return t
    return L


def self_attention(x_ncl, mask, Wq, Wk, Wv, Wo, *,
                   q_tile=None, kv_tile=None, compute_dtype=jnp.bfloat16):
    """x_ncl: (B, D, L) float32 (channels-first, as the PyTorch module consumes).
    mask: (B, L).  Returns (B, D, L) float32, matching `out.transpose(1, 2)`."""
    B, D_, L = x_ncl.shape
    assert D_ == D and Dv * Nh == D

    Tq = q_tile if q_tile is not None else _pick_tile(L, 256)
    Tk = kv_tile if kv_tile is not None else _pick_tile(L, 512)
    assert L % Tq == 0 and L % Tk == 0
    # TODO(synk): for peak throughput, callers should pad L (and the mask) to a
    # multiple of 128 so every tile is lane-dense; other lengths fall back to a
    # single full-length tile.

    scale = 1.0 / math.sqrt(Dk)
    # Fused projection weights, prepared once in XLA:
    #   wq_f : (D, Nh*Dk)        x_q^T @ wq_f -> (Tq, Nh*Dk), score scale folded in
    #   wkv_f: (Nh*(Dk+Dv), D)   wkv_f @ x_kv -> (Nh*Dk+Nh*Dv, Tk)
    #   wo_t : (Dv*Nh, D) = Wo^T wo_t @ ctx   -> (D, Tq), no output transpose
    wq_f = jnp.transpose(Wq * scale, (1, 0, 2)).reshape(D, Nh * Dk)
    wk_t = jnp.transpose(Wk, (0, 2, 1)).reshape(Nh * Dk, D)
    wv_t = jnp.transpose(Wv, (0, 2, 1)).reshape(Nh * Dv, D)
    wkv_f = jnp.concatenate([wk_t, wv_t], axis=0)
    wo_t = jnp.transpose(Wo)

    wq_f = wq_f.astype(compute_dtype)
    wkv_f = wkv_f.astype(compute_dtype)
    wo_t = wo_t.astype(compute_dtype)

    mask3 = mask[:, None, :].astype(jnp.float32)                          # (B, 1, L)

    grid = (B, L // Tq, L // Tk)
    kernel = functools.partial(_self_attention_kernel, compute_dtype=compute_dtype)

    out = pl.pallas_call(
        kernel,
        out_shape=jax.ShapeDtypeStruct((B, D_, L), jnp.float32),
        grid_spec=pltpu.PrefetchScalarGridSpec(
            num_scalar_prefetch=0,
            grid=grid,
            in_specs=[
                pl.BlockSpec((None, D, Tq), lambda b, qi, ki: (b, 0, qi)),    # x (q tile)
                pl.BlockSpec((None, D, Tk), lambda b, qi, ki: (b, 0, ki)),    # x (kv tile)
                pl.BlockSpec((None, 1, Tk), lambda b, qi, ki: (b, 0, ki)),    # key mask
                pl.BlockSpec((None, 1, Tq), lambda b, qi, ki: (b, 0, qi)),    # query mask
                pl.BlockSpec((D, Nh * Dk), lambda b, qi, ki: (0, 0)),         # Wq fused
                pl.BlockSpec((Nh * (Dk + Dv), D), lambda b, qi, ki: (0, 0)),  # [Wk^T; Wv^T]
                pl.BlockSpec((Dv * Nh, D), lambda b, qi, ki: (0, 0)),         # Wo^T
            ],
            out_specs=pl.BlockSpec((None, D, Tq), lambda b, qi, ki: (b, 0, qi)),
            scratch_shapes=[
                pltpu.VMEM((Tq, Nh * Dk), jnp.float32),   # projected queries (persist over kv)
                pltpu.VMEM((Nh * Dv, Tq), jnp.float32),   # running context, lane-dense
                pltpu.VMEM((Nh, Tq, 1), jnp.float32),     # running max   (per head, per query)
                pltpu.VMEM((Nh, Tq, 1), jnp.float32),     # running denom (per head, per query)
            ],
        ),
        compiler_params=pltpu.CompilerParams(
            dimension_semantics=("parallel", "parallel", "arbitrary")),
    )(x_ncl, x_ncl, mask3, mask3, wq_f, wkv_f, wo_t)
    return out                                                            # (B, D, L)


# ------------------------------ pure-JAX reference ---------------------------
def self_attention_ref(x_ncl, mask, Wq, Wk, Wv, Wo):
    x = jnp.transpose(x_ncl, (0, 2, 1))          # (B, L, D)
    hmask = mask[:, None, :]
    vmask = mask[:, :, None]
    scale = 1.0 / math.sqrt(Dk)
    heads = []
    for h in range(Nh):
        q = x @ Wq[h]
        k = x @ Wk[h]
        v = x @ Wv[h]
        s = jnp.einsum("blk,bmk->blm", q, k) * scale
        s = s * hmask + (1 - hmask) * NEG_INF
        p = jax.nn.softmax(s, axis=2) * vmask
        heads.append(p @ v)
    head = jnp.concatenate(heads, axis=2)
    out = head @ Wo                               # contraction over Wo's rows (D == Dv*Nh)
    return jnp.transpose(out, (0, 2, 1))


# -------------------------------- parameter init -----------------------------
def init_params(key):
    k_o, k_q, k_k, k_v = jax.random.split(key, 4)
    # kaiming_uniform_ (a=0): bound = sqrt(6 / fan_in), fan_in = Dv*Nh
    bo = math.sqrt(6.0 / (Dv * Nh))
    Wo = jax.random.uniform(k_o, (D, Dv * Nh), jnp.float32, -bo, bo)
    # xavier_uniform_: bound = sqrt(6 / (fan_in + fan_out))
    bqk = math.sqrt(6.0 / (D + Dk))
    bv = math.sqrt(6.0 / (D + Dv))
    Wq = jax.random.uniform(k_q, (Nh, D, Dk), jnp.float32, -bqk, bqk)
    Wk = jax.random.uniform(k_k, (Nh, D, Dk), jnp.float32, -bqk, bqk)
    Wv = jax.random.uniform(k_v, (Nh, D, Dv), jnp.float32, -bv, bv)
    return Wq, Wk, Wv, Wo


if __name__ == "__main__":
    key = jax.random.PRNGKey(0)
    kx1, kx2, kp = jax.random.split(key, 3)
    Wq, Wk, Wv, Wo = init_params(kp)

    # ---- tiny shape from the spec (B=2, L=8), f32 path, tight check ----------
    B, L = 2, 8
    x = jax.random.normal(kx1, (B, D, L), jnp.float32)                 # (B, D, L), NCL
    lengths = jnp.array([8, 5], dtype=jnp.int32)
    mask = (jnp.arange(L)[None, :] < lengths[:, None]).astype(jnp.float32)

    out = jax.block_until_ready(
        self_attention(x, mask, Wq, Wk, Wv, Wo, compute_dtype=jnp.float32))
    ref = self_attention_ref(x, mask, Wq, Wk, Wv, Wo)
    assert out.shape == (B, D, L)
    err = float(jnp.max(jnp.abs(out - ref)))
    assert jnp.allclose(out, ref, atol=5e-3, rtol=5e-3), err           # approx reciprocal only

    # ---- multi-tile case: exercises the online-softmax kv loop ---------------
    B2, L2 = 2, 256
    x2 = jax.random.normal(kx2, (B2, D, L2), jnp.float32)
    lengths2 = jnp.array([256, 100], dtype=jnp.int32)                  # batch 1: a fully-masked kv tile
    mask2 = (jnp.arange(L2)[None, :] < lengths2[:, None]).astype(jnp.float32)
    ref2 = self_attention_ref(x2, mask2, Wq, Wk, Wv, Wo)

    out2_f32 = jax.block_until_ready(
        self_attention(x2, mask2, Wq, Wk, Wv, Wo,
                       q_tile=128, kv_tile=128, compute_dtype=jnp.float32))
    err2 = float(jnp.max(jnp.abs(out2_f32 - ref2)))
    assert jnp.allclose(out2_f32, ref2, atol=5e-3, rtol=5e-3), err2

    out2_bf16 = jax.block_until_ready(
        self_attention(x2, mask2, Wq, Wk, Wv, Wo,
                       q_tile=128, kv_tile=128, compute_dtype=jnp.bfloat16))
    err3 = float(jnp.max(jnp.abs(out2_bf16 - ref2)))
    assert jnp.allclose(out2_bf16, ref2, atol=5e-2, rtol=5e-2), err3   # bf16 MXU operands

    print("KERNEL_OK")
</pallas_src>

<mosaic_0001>
module attributes {stable_mosaic.version = 11 : i64} {
  func.func @_self_attention_kernel(%arg0: i32, %arg1: i32, %arg2: i32, %arg3: memref<1x32x8xf32, #tpu.memory_space<vmem>>, %arg4: memref<1x32x8xf32, #tpu.memory_space<vmem>>, %arg5: memref<1x1x8xf32, #tpu.memory_space<vmem>>, %arg6: memref<1x1x8xf32, #tpu.memory_space<vmem>>, %arg7: memref<32x32xf32, #tpu.memory_space<vmem>>, %arg8: memref<64x32xf32, #tpu.memory_space<vmem>>, %arg9: memref<32x32xf32, #tpu.memory_space<vmem>>, %arg10: memref<1x32x8xf32, #tpu.memory_space<vmem>>, %arg11: memref<8x32xf32, #tpu.memory_space<vmem>>, %arg12: memref<32x8xf32, #tpu.memory_space<vmem>>, %arg13: memref<4x8x1xf32, #tpu.memory_space<vmem>>, %arg14: memref<4x8x1xf32, #tpu.memory_space<vmem>>) attributes {dimension_semantics = [#tpu.dimension_semantics<parallel>, #tpu.dimension_semantics<parallel>, #tpu.dimension_semantics<arbitrary>], iteration_bounds = array<i64: 2, 1, 1>, scalar_prefetch = 0 : i64, scratch_operands = 4 : i64, tpu.core_type = #tpu.core_type<tc>, window_params = [{transform_indices = @transform_0, window_bounds = array<i64: 1, 32, 8>}, {transform_indices = @transform_1, window_bounds = array<i64: 1, 32, 8>}, {transform_indices = @transform_2, window_bounds = array<i64: 1, 1, 8>}, {transform_indices = @transform_3, window_bounds = array<i64: 1, 1, 8>}, {pipeline_mode = #tpu.pipeline_mode<synchronous>, transform_indices = @transform_4, window_bounds = array<i64: 32, 32>}, {pipeline_mode = #tpu.pipeline_mode<synchronous>, transform_indices = @transform_5, window_bounds = array<i64: 64, 32>}, {pipeline_mode = #tpu.pipeline_mode<synchronous>, transform_indices = @transform_6, window_bounds = array<i64: 32, 32>}, {transform_indices = @transform_7, window_bounds = array<i64: 1, 32, 8>}]} {
    %c0_i32 = arith.constant 0 : i32
    %0 = arith.cmpi eq, %arg2, %c0_i32 : i32
    %1 = arith.extui %0 : i1 to i32
    %c0_i32_0 = arith.constant 0 : i32
    %2 = arith.cmpi ne, %1, %c0_i32_0 : i32
    scf.if %2 {
      %c0_94 = arith.constant 0 : index
      %c0_95 = arith.constant 0 : index
      %c0_96 = arith.constant 0 : index
      %164 = vector.load %arg3[%c0_94, %c0_95, %c0_96] : memref<1x32x8xf32, #tpu.memory_space<vmem>>, vector<1x32x8xf32>
      %165 = vector.shape_cast %164 : vector<1x32x8xf32> to vector<32x8xf32>
      %166 = tpu.transpose %165, [1, 0] : vector<32x8xf32> -> vector<8x32xf32>
      %c0_97 = arith.constant 0 : index
      %c0_98 = arith.constant 0 : index
      %167 = vector.load %arg7[%c0_97, %c0_98] : memref<32x32xf32, #tpu.memory_space<vmem>>, vector<32x32xf32>
      %cst_99 = arith.constant dense<0.000000e+00> : vector<8x32xf32>
      %168 = tpu.matmul %166, %167, %cst_99 {dimension_numbers = #tpu.dot_dimension_numbers<[1], [0], [0], [1], [0, 0, 1, 1], [], []>} : vector<8x32xf32>, vector<32x32xf32>, vector<8x32xf32> -> vector<8x32xf32>
      %c0_100 = arith.constant 0 : index
      %c0_101 = arith.constant 0 : index
      %169 = vector.load %arg11[%c0_100, %c0_101] : memref<8x32xf32, #tpu.memory_space<vmem>>, vector<8x32xf32>
      tpu.vector_store %arg11[%c0_100, %c0_101], %168 {strides = array<i32>} : memref<8x32xf32, #tpu.memory_space<vmem>>, vector<8x32xf32>,
      %cst_102 = arith.constant 0xFF800000 : f32
      %170 = vector.broadcast %cst_102 : f32 to vector<4x8x1xf32>
      %c0_103 = arith.constant 0 : index
      %c0_104 = arith.constant 0 : index
      %c0_105 = arith.constant 0 : index
      %171 = vector.load %arg13[%c0_103, %c0_104, %c0_105] : memref<4x8x1xf32, #tpu.memory_space<vmem>>, vector<4x8x1xf32>
      tpu.vector_store %arg13[%c0_103, %c0_104, %c0_105], %170 {strides = array<i32>} : memref<4x8x1xf32, #tpu.memory_space<vmem>>, vector<4x8x1xf32>,
      %cst_106 = arith.constant 0.000000e+00 : f32
      %172 = vector.broadcast %cst_106 : f32 to vector<4x8x1xf32>
      %c0_107 = arith.constant 0 : index
      %c0_108 = arith.constant 0 : index
      %c0_109 = arith.constant 0 : index
      %173 = vector.load %arg14[%c0_107, %c0_108, %c0_109] : memref<4x8x1xf32, #tpu.memory_space<vmem>>, vector<4x8x1xf32>
      tpu.vector_store %arg14[%c0_107, %c0_108, %c0_109], %172 {strides = array<i32>} : memref<4x8x1xf32, #tpu.memory_space<vmem>>, vector<4x8x1xf32>,
      %cst_110 = arith.constant 0.000000e+00 : f32
      %174 = vector.broadcast %cst_110 : f32 to vector<32x8xf32>
      %c0_111 = arith.constant 0 : index
      %c0_112 = arith.constant 0 : index
      %175 = vector.load %arg12[%c0_111, %c0_112] : memref<32x8xf32, #tpu.memory_space<vmem>>, vector<32x8xf32>
      tpu.vector_store %arg12[%c0_111, %c0_112], %174 {strides = array<i32>} : memref<32x8xf32, #tpu.memory_space<vmem>>, vector<32x8xf32>,
    } else {
    }
    %c0 = arith.constant 0 : index
    %c0_1 = arith.constant 0 : index
    %c0_2 = arith.constant 0 : index
    %3 = vector.load %arg4[%c0, %c0_1, %c0_2] : memref<1x32x8xf32, #tpu.memory_space<vmem>>, vector<1x32x8xf32>
    %4 = vector.shape_cast %3 : vector<1x32x8xf32> to vector<32x8xf32>
    %c0_3 = arith.constant 0 : index
    %c0_4 = arith.constant 0 : index
    %5 = vector.load %arg8[%c0_3, %c0_4] : memref<64x32xf32, #tpu.memory_space<vmem>>, vector<64x32xf32>
    %cst = arith.constant dense<0.000000e+00> : vector<64x8xf32>
    %6 = tpu.matmul %5, %4, %cst {dimension_numbers = #tpu.dot_dimension_numbers<[1], [0], [0], [1], [0, 0, 1, 1], [], []>} : vector<64x32xf32>, vector<32x8xf32>, vector<64x8xf32> -> vector<64x8xf32>
    %c0_5 = arith.constant 0 : index
    %c0_6 = arith.constant 0 : index
    %c0_7 = arith.constant 0 : index
    %7 = vector.load %arg5[%c0_5, %c0_6, %c0_7] : memref<1x1x8xf32, #tpu.memory_space<vmem>>, vector<1x1x8xf32>
    %8 = vector.shape_cast %7 : vector<1x1x8xf32> to vector<1x8xf32>
    %cst_8 = arith.constant 1.000000e+00 : f32
    %9 = vector.broadcast %cst_8 : f32 to vector<1x8xf32>
    %10 = arith.subf %9, %8 : vector<1x8xf32>
    %cst_9 = arith.constant -1.000000e+30 : f32
    %11 = vector.broadcast %cst_9 : f32 to vector<1x8xf32>
    %12 = arith.mulf %10, %11 : vector<1x8xf32>
    %c0_10 = arith.constant 0 : index
    %c0_11 = arith.constant 0 : index
    %13 = vector.load %arg11[%c0_10, %c0_11] : memref<8x32xf32, #tpu.memory_space<vmem>>, vector<8x8xf32>
    %14 = vector.extract_strided_slice %6 {offsets = [0, 0], sizes = [8, 8], strides = [1, 1]} : vector<64x8xf32> to vector<8x8xf32>
    %15 = vector.extract_strided_slice %6 {offsets = [32, 0], sizes = [8, 8], strides = [1, 1]} : vector<64x8xf32> to vector<8x8xf32>
    %cst_12 = arith.constant dense<0.000000e+00> : vector<8x8xf32>
    %16 = tpu.matmul %13, %14, %cst_12 {dimension_numbers = #tpu.dot_dimension_numbers<[1], [0], [0], [1], [0, 0, 1, 1], [], []>} : vector<8x8xf32>, vector<8x8xf32>, vector<8x8xf32> -> vector<8x8xf32>
    %17 = vector.broadcast %8 : vector<1x8xf32> to vector<8x8xf32>
    %18 = arith.mulf %16, %17 : vector<8x8xf32>
    %19 = vector.broadcast %12 : vector<1x8xf32> to vector<8x8xf32>
    %20 = arith.addf %18, %19 : vector<8x8xf32>
    %c0_13 = arith.constant 0 : index
    %c0_14 = arith.constant 0 : index
    %c0_15 = arith.constant 0 : index
    %21 = vector.load %arg13[%c0_13, %c0_14, %c0_15] : memref<4x8x1xf32, #tpu.memory_space<vmem>>, vector<1x8x1xf32>
    %22 = vector.shape_cast %21 : vector<1x8x1xf32> to vector<8x1xf32>
    %cst_16 = arith.constant dense<0xFF800000> : vector<8xf32>
    %23 = vector.multi_reduction <maximumf>, %20, %cst_16 [1] : vector<8x8xf32> to vector<8xf32>
    %24 = vector.shape_cast %23 : vector<8xf32> to vector<8x1xf32>
    %25 = arith.maximumf %22, %24 : vector<8x1xf32>
    %26 = arith.subf %22, %25 : vector<8x1xf32>
    %27 = math.exp %26 : vector<8x1xf32>
    %28 = vector.broadcast %25 : vector<8x1xf32> to vector<8x8xf32>
    %29 = arith.subf %20, %28 : vector<8x8xf32>
    %30 = math.exp %29 : vector<8x8xf32>
    %c0_17 = arith.constant 0 : index
    %c0_18 = arith.constant 0 : index
    %c0_19 = arith.constant 0 : index
    %31 = vector.load %arg14[%c0_17, %c0_18, %c0_19] : memref<4x8x1xf32, #tpu.memory_space<vmem>>, vector<1x8x1xf32>
    %32 = vector.shape_cast %31 : vector<1x8x1xf32> to vector<8x1xf32>
    %33 = arith.mulf %27, %32 : vector<8x1xf32>
    %cst_20 = arith.constant dense<0.000000e+00> : vector<8xf32>
    %34 = vector.multi_reduction <add>, %30, %cst_20 [1] : vector<8x8xf32> to vector<8xf32>
    %35 = vector.shape_cast %34 : vector<8xf32> to vector<8x1xf32>
    %36 = arith.addf %33, %35 : vector<8x1xf32>
    %c0_21 = arith.constant 0 : index
    %c0_22 = arith.constant 0 : index
    %c0_23 = arith.constant 0 : index
    %37 = vector.load %arg14[%c0_21, %c0_22, %c0_23] : memref<4x8x1xf32, #tpu.memory_space<vmem>>, vector<1x8x1xf32>
    %38 = vector.shape_cast %37 : vector<1x8x1xf32> to vector<8x1xf32>
    %39 = vector.shape_cast %36 : vector<8x1xf32> to vector<1x8x1xf32>
    tpu.vector_store %arg14[%c0_21, %c0_22, %c0_23], %39 {strides = array<i32>} : memref<4x8x1xf32, #tpu.memory_space<vmem>>, vector<1x8x1xf32>,
    %c0_24 = arith.constant 0 : index
    %c0_25 = arith.constant 0 : index
    %c0_26 = arith.constant 0 : index
    %40 = vector.load %arg13[%c0_24, %c0_25, %c0_26] : memref<4x8x1xf32, #tpu.memory_space<vmem>>, vector<1x8x1xf32>
    %41 = vector.shape_cast %40 : vector<1x8x1xf32> to vector<8x1xf32>
    %42 = vector.shape_cast %25 : vector<8x1xf32> to vector<1x8x1xf32>
    tpu.vector_store %arg13[%c0_24, %c0_25, %c0_26], %42 {strides = array<i32>} : memref<4x8x1xf32, #tpu.memory_space<vmem>>, vector<1x8x1xf32>,
    %cst_27 = arith.constant dense<0.000000e+00> : vector<8x8xf32>
    %43 = tpu.matmul %15, %30, %cst_27 {dimension_numbers = #tpu.dot_dimension_numbers<[1], [1], [0], [0], [0, 0, 1, 0], [], []>} : vector<8x8xf32>, vector<8x8xf32>, vector<8x8xf32> -> vector<8x8xf32>
    %44 = tpu.transpose %27, [1, 0] : vector<8x1xf32> -> vector<1x8xf32>
    %c0_28 = arith.constant 0 : index
    %c0_29 = arith.constant 0 : index
    %45 = vector.load %arg12[%c0_28, %c0_29] : memref<32x8xf32, #tpu.memory_space<vmem>>, vector<8x8xf32>
    %46 = vector.broadcast %44 : vector<1x8xf32> to vector<8x8xf32>
    %47 = arith.mulf %46, %45 : vector<8x8xf32>
    %48 = arith.addf %47, %43 : vector<8x8xf32>
    %c0_30 = arith.constant 0 : index
    %c0_31 = arith.constant 0 : index
    %49 = vector.load %arg12[%c0_30, %c0_31] : memref<32x8xf32, #tpu.memory_space<vmem>>, vector<8x8xf32>
    tpu.vector_store %arg12[%c0_30, %c0_31], %48 {strides = array<i32>} : memref<32x8xf32, #tpu.memory_space<vmem>>, vector<8x8xf32>,
    %c0_32 = arith.constant 0 : index
    %c8 = arith.constant 8 : index
    %50 = vector.load %arg11[%c0_32, %c8] : memref<8x32xf32, #tpu.memory_space<vmem>>, vector<8x8xf32>
    %51 = vector.extract_strided_slice %6 {offsets = [8, 0], sizes = [8, 8], strides = [1, 1]} : vector<64x8xf32> to vector<8x8xf32>
    %52 = vector.extract_strided_slice %6 {offsets = [40, 0], sizes = [8, 8], strides = [1, 1]} : vector<64x8xf32> to vector<8x8xf32>
    %cst_33 = arith.constant dense<0.000000e+00> : vector<8x8xf32>
    %53 = tpu.matmul %50, %51, %cst_33 {dimension_numbers = #tpu.dot_dimension_numbers<[1], [0], [0], [1], [0, 0, 1, 1], [], []>} : vector<8x8xf32>, vector<8x8xf32>, vector<8x8xf32> -> vector<8x8xf32>
    %54 = vector.broadcast %8 : vector<1x8xf32> to vector<8x8xf32>
    %55 = arith.mulf %53, %54 : vector<8x8xf32>
    %56 = vector.broadcast %12 : vector<1x8xf32> to vector<8x8xf32>
    %57 = arith.addf %55, %56 : vector<8x8xf32>
    %c1 = arith.constant 1 : index
    %c0_34 = arith.constant 0 : index
    %c0_35 = arith.constant 0 : index
    %58 = vector.load %arg13[%c1, %c0_34, %c0_35] : memref<4x8x1xf32, #tpu.memory_space<vmem>>, vector<1x8x1xf32>
    %59 = vector.shape_cast %58 : vector<1x8x1xf32> to vector<8x1xf32>
    %cst_36 = arith.constant dense<0xFF800000> : vector<8xf32>
    %60 = vector.multi_reduction <maximumf>, %57, %cst_36 [1] : vector<8x8xf32> to vector<8xf32>
    %61 = vector.shape_cast %60 : vector<8xf32> to vector<8x1xf32>
    %62 = arith.maximumf %59, %61 : vector<8x1xf32>
    %63 = arith.subf %59, %62 : vector<8x1xf32>
    %64 = math.exp %63 : vector<8x1xf32>
    %65 = vector.broadcast %62 : vector<8x1xf32> to vector<8x8xf32>
    %66 = arith.subf %57, %65 : vector<8x8xf32>
    %67 = math.exp %66 : vector<8x8xf32>
    %c1_37 = arith.constant 1 : index
    %c0_38 = arith.constant 0 : index
    %c0_39 = arith.constant 0 : index
    %68 = vector.load %arg14[%c1_37, %c0_38, %c0_39] : memref<4x8x1xf32, #tpu.memory_space<vmem>>, vector<1x8x1xf32>
    %69 = vector.shape_cast %68 : vector<1x8x1xf32> to vector<8x1xf32>
    %70 = arith.mulf %64, %69 : vector<8x1xf32>
    %cst_40 = arith.constant dense<0.000000e+00> : vector<8xf32>
    %71 = vector.multi_reduction <add>, %67, %cst_40 [1] : vector<8x8xf32> to vector<8xf32>
    %72 = vector.shape_cast %71 : vector<8xf32> to vector<8x1xf32>
    %73 = arith.addf %70, %72 : vector<8x1xf32>
    %c1_41 = arith.constant 1 : index
    %c0_42 = arith.constant 0 : index
    %c0_43 = arith.constant 0 : index
    %74 = vector.load %arg14[%c1_41, %c0_42, %c0_43] : memref<4x8x1xf32, #tpu.memory_space<vmem>>, vector<1x8x1xf32>
    %75 = vector.shape_cast %74 : vector<1x8x1xf32> to vector<8x1xf32>
    %76 = vector.shape_cast %73 : vector<8x1xf32> to vector<1x8x1xf32>
    tpu.vector_store %arg14[%c1_41, %c0_42, %c0_43], %76 {strides = array<i32>} : memref<4x8x1xf32, #tpu.memory_space<vmem>>, vector<1x8x1xf32>,
    %c1_44 = arith.constant 1 : index
    %c0_45 = arith.constant 0 : index
    %c0_46 = arith.constant 0 : index
    %77 = vector.load %arg13[%c1_44, %c0_45, %c0_46] : memref<4x8x1xf32, #tpu.memory_space<vmem>>, vector<1x8x1xf32>
    %78 = vector.shape_cast %77 : vector<1x8x1xf32> to vector<8x1xf32>
    %79 = vector.shape_cast %62 : vector<8x1xf32> to vector<1x8x1xf32>
    tpu.vector_store %arg13[%c1_44, %c0_45, %c0_46], %79 {strides = array<i32>} : memref<4x8x1xf32, #tpu.memory_space<vmem>>, vector<1x8x1xf32>,
    %cst_47 = arith.constant dense<0.000000e+00> : vector<8x8xf32>
    %80 = tpu.matmul %52, %67, %cst_47 {dimension_numbers = #tpu.dot_dimension_numbers<[1], [1], [0], [0], [0, 0, 1, 0], [], []>} : vector<8x8xf32>, vector<8x8xf32>, vector<8x8xf32> -> vector<8x8xf32>
    %81 = tpu.transpose %64, [1, 0] : vector<8x1xf32> -> vector<1x8xf32>
    %c8_48 = arith.constant 8 : index
    %c0_49 = arith.constant 0 : index
    %82 = vector.load %arg12[%c8_48, %c0_49] : memref<32x8xf32, #tpu.memory_space<vmem>>, vector<8x8xf32>
    %83 = vector.broadcast %81 : vector<1x8xf32> to vector<8x8xf32>
    %84 = arith.mulf %83, %82 : vector<8x8xf32>
    %85 = arith.addf %84, %80 : vector<8x8xf32>
    %c8_50 = arith.constant 8 : index
    %c0_51 = arith.constant 0 : index
    %86 = vector.load %arg12[%c8_50, %c0_51] : memref<32x8xf32, #tpu.memory_space<vmem>>, vector<8x8xf32>
    tpu.vector_store %arg12[%c8_50, %c0_51], %85 {strides = array<i32>} : memref<32x8xf32, #tpu.memory_space<vmem>>, vector<8x8xf32>,
    %c0_52 = arith.constant 0 : index
    %c16 = arith.constant 16 : index
    %87 = vector.load %arg11[%c0_52, %c16] : memref<8x32xf32, #tpu.memory_space<vmem>>, vector<8x8xf32>
    %88 = vector.extract_strided_slice %6 {offsets = [16, 0], sizes = [8, 8], strides = [1, 1]} : vector<64x8xf32> to vector<8x8xf32>
    %89 = vector.extract_strided_slice %6 {offsets = [48, 0], sizes = [8, 8], strides = [1, 1]} : vector<64x8xf32> to vector<8x8xf32>
    %cst_53 = arith.constant dense<0.000000e+00> : vector<8x8xf32>
    %90 = tpu.matmul %87, %88, %cst_53 {dimension_numbers = #tpu.dot_dimension_numbers<[1], [0], [0], [1], [0, 0, 1, 1], [], []>} : vector<8x8xf32>, vector<8x8xf32>, vector<8x8xf32> -> vector<8x8xf32>
    %91 = vector.broadcast %8 : vector<1x8xf32> to vector<8x8xf32>
    %92 = arith.mulf %90, %91 : vector<8x8xf32>
    %93 = vector.broadcast %12 : vector<1x8xf32> to vector<8x8xf32>
    %94 = arith.addf %92, %93 : vector<8x8xf32>
    %c2 = arith.constant 2 : index
    %c0_54 = arith.constant 0 : index
    %c0_55 = arith.constant 0 : index
    %95 = vector.load %arg13[%c2, %c0_54, %c0_55] : memref<4x8x1xf32, #tpu.memory_space<vmem>>, vector<1x8x1xf32>
    %96 = vector.shape_cast %95 : vector<1x8x1xf32> to vector<8x1xf32>
    %cst_56 = arith.constant dense<0xFF800000> : vector<8xf32>
    %97 = vector.multi_reduction <maximumf>, %94, %cst_56 [1] : vector<8x8xf32> to vector<8xf32>
    %98 = vector.shape_cast %97 : vector<8xf32> to vector<8x1xf32>
    %99 = arith.maximumf %96, %98 : vector<8x1xf32>
    %100 = arith.subf %96, %99 : vector<8x1xf32>
    %101 = math.exp %100 : vector<8x1xf32>
    %102 = vector.broadcast %99 : vector<8x1xf32> to vector<8x8xf32>
    %103 = arith.subf %94, %102 : vector<8x8xf32>
    %104 = math.exp %103 : vector<8x8xf32>
    %c2_57 = arith.constant 2 : index
    %c0_58 = arith.constant 0 : index
    %c0_59 = arith.constant 0 : index
    %105 = vector.load %arg14[%c2_57, %c0_58, %c0_59] : memref<4x8x1xf32, #tpu.memory_space<vmem>>, vector<1x8x1xf32>
    %106 = vector.shape_cast %105 : vector<1x8x1xf32> to vector<8x1xf32>
    %107 = arith.mulf %101, %106 : vector<8x1xf32>
    %cst_60 = arith.constant dense<0.000000e+00> : vector<8xf32>
    %108 = vector.multi_reduction <add>, %104, %cst_60 [1] : vector<8x8xf32> to vector<8xf32>
    %109 = vector.shape_cast %108 : vector<8xf32> to vector<8x1xf32>
    %110 = arith.addf %107, %109 : vector<8x1xf32>
    %c2_61 = arith.constant 2 : index
    %c0_62 = arith.constant 0 : index
    %c0_63 = arith.constant 0 : index
    %111 = vector.load %arg14[%c2_61, %c0_62, %c0_63] : memref<4x8x1xf32, #tpu.memory_space<vmem>>, vector<1x8x1xf32>
    %112 = vector.shape_cast %111 : vector<1x8x1xf32> to vector<8x1xf32>
    %113 = vector.shape_cast %110 : vector<8x1xf32> to vector<1x8x1xf32>
    tpu.vector_store %arg14[%c2_61, %c0_62, %c0_63], %113 {strides = array<i32>} : memref<4x8x1xf32, #tpu.memory_space<vmem>>, vector<1x8x1xf32>,
    %c2_64 = arith.constant 2 : index
    %c0_65 = arith.constant 0 : index
    %c0_66 = arith.constant 0 : index
    %114 = vector.load %arg13[%c2_64, %c0_65, %c0_66] : memref<4x8x1xf32, #tpu.memory_space<vmem>>, vector<1x8x1xf32>
    %115 = vector.shape_cast %114 : vector<1x8x1xf32> to vector<8x1xf32>
    %116 = vector.shape_cast %99 : vector<8x1xf32> to vector<1x8x1xf32>
    tpu.vector_store %arg13[%c2_64, %c0_65, %c0_66], %116 {strides = array<i32>} : memref<4x8x1xf32, #tpu.memory_space<vmem>>, vector<1x8x1xf32>,
    %cst_67 = arith.constant dense<0.000000e+00> : vector<8x8xf32>
    %117 = tpu.matmul %89, %104, %cst_67 {dimension_numbers = #tpu.dot_dimension_numbers<[1], [1], [0], [0], [0, 0, 1, 0], [], []>} : vector<8x8xf32>, vector<8x8xf32>, vector<8x8xf32> -> vector<8x8xf32>
    %118 = tpu.transpose %101, [1, 0] : vector<8x1xf32> -> vector<1x8xf32>
    %c16_68 = arith.constant 16 : index
    %c0_69 = arith.constant 0 : index
    %119 = vector.load %arg12[%c16_68, %c0_69] : memref<32x8xf32, #tpu.memory_space<vmem>>, vector<8x8xf32>
    %120 = vector.broadcast %118 : vector<1x8xf32> to vector<8x8xf32>
    %121 = arith.mulf %120, %119 : vector<8x8xf32>
    %122 = arith.addf %121, %117 : vector<8x8xf32>
    %c16_70 = arith.constant 16 : index
    %c0_71 = arith.constant 0 : index
    %123 = vector.load %arg12[%c16_70, %c0_71] : memref<32x8xf32, #tpu.memory_space<vmem>>, vector<8x8xf32>
    tpu.vector_store %arg12[%c16_70, %c0_71], %122 {strides = array<i32>} : memref<32x8xf32, #tpu.memory_space<vmem>>, vector<8x8xf32>,
    %c0_72 = arith.constant 0 : index
    %c24 = arith.constant 24 : index
    %124 = vector.load %arg11[%c0_72, %c24] : memref<8x32xf32, #tpu.memory_space<vmem>>, vector<8x8xf32>
    %125 = vector.extract_strided_slice %6 {offsets = [24, 0], sizes = [8, 8], strides = [1, 1]} : vector<64x8xf32> to vector<8x8xf32>
    %126 = vector.extract_strided_slice %6 {offsets = [56, 0], sizes = [8, 8], strides = [1, 1]} : vector<64x8xf32> to vector<8x8xf32>
    %cst_73 = arith.constant dense<0.000000e+00> : vector<8x8xf32>
    %127 = tpu.matmul %124, %125, %cst_73 {dimension_numbers = #tpu.dot_dimension_numbers<[1], [0], [0], [1], [0, 0, 1, 1], [], []>} : vector<8x8xf32>, vector<8x8xf32>, vector<8x8xf32> -> vector<8x8xf32>
    %128 = vector.broadcast %8 : vector<1x8xf32> to vector<8x8xf32>
    %129 = arith.mulf %127, %128 : vector<8x8xf32>
    %130 = vector.broadcast %12 : vector<1x8xf32> to vector<8x8xf32>
    %131 = arith.addf %129, %130 : vector<8x8xf32>
    %c3 = arith.constant 3 : index
    %c0_74 = arith.constant 0 : index
    %c0_75 = arith.constant 0 : index
    %132 = vector.load %arg13[%c3, %c0_74, %c0_75] : memref<4x8x1xf32, #tpu.memory_space<vmem>>, vector<1x8x1xf32>
    %133 = vector.shape_cast %132 : vector<1x8x1xf32> to vector<8x1xf32>
    %cst_76 = arith.constant dense<0xFF800000> : vector<8xf32>
    %134 = vector.multi_reduction <maximumf>, %131, %cst_76 [1] : vector<8x8xf32> to vector<8xf32>
    %135 = vector.shape_cast %134 : vector<8xf32> to vector<8x1xf32>
    %136 = arith.maximumf %133, %135 : vector<8x1xf32>
    %137 = arith.subf %133, %136 : vector<8x1xf32>
    %138 = math.exp %137 : vector<8x1xf32>
    %139 = vector.broadcast %136 : vector<8x1xf32> to vector<8x8xf32>
    %140 = arith.subf %131, %139 : vector<8x8xf32>
    %141 = math.exp %140 : vector<8x8xf32>
    %c3_77 = arith.constant 3 : index
    %c0_78 = arith.constant 0 : index
    %c0_79 = arith.constant 0 : index
    %142 = vector.load %arg14[%c3_77, %c0_78, %c0_79] : memref<4x8x1xf32, #tpu.memory_space<vmem>>, vector<1x8x1xf32>
    %143 = vector.shape_cast %142 : vector<1x8x1xf32> to vector<8x1xf32>
    %144 = arith.mulf %138, %143 : vector<8x1xf32>
    %cst_80 = arith.constant dense<0.000000e+00> : vector<8xf32>
    %145 = vector.multi_reduction <add>, %141, %cst_80 [1] : vector<8x8xf32> to vector<8xf32>
    %146 = vector.shape_cast %145 : vector<8xf32> to vector<8x1xf32>
    %147 = arith.addf %144, %146 : vector<8x1xf32>
    %c3_81 = arith.constant 3 : index
    %c0_82 = arith.constant 0 : index
    %c0_83 = arith.constant 0 : index
    %148 = vector.load %arg14[%c3_81, %c0_82, %c0_83] : memref<4x8x1xf32, #tpu.memory_space<vmem>>, vector<1x8x1xf32>
    %149 = vector.shape_cast %148 : vector<1x8x1xf32> to vector<8x1xf32>
    %150 = vector.shape_cast %147 : vector<8x1xf32> to vector<1x8x1xf32>
    tpu.vector_store %arg14[%c3_81, %c0_82, %c0_83], %150 {strides = array<i32>} : memref<4x8x1xf32, #tpu.memory_space<vmem>>, vector<1x8x1xf32>,
    %c3_84 = arith.constant 3 : index
    %c0_85 = arith.constant 0 : index
    %c0_86 = arith.constant 0 : index
    %151 = vector.load %arg13[%c3_84, %c0_85, %c0_86] : memref<4x8x1xf32, #tpu.memory_space<vmem>>, vector<1x8x1xf32>
    %152 = vector.shape_cast %151 : vector<1x8x1xf32> to vector<8x1xf32>
    %153 = vector.shape_cast %136 : vector<8x1xf32> to vector<1x8x1xf32>
    tpu.vector_store %arg13[%c3_84, %c0_85, %c0_86], %153 {strides = array<i32>} : memref<4x8x1xf32, #tpu.memory_space<vmem>>, vector<1x8x1xf32>,
    %cst_87 = arith.constant dense<0.000000e+00> : vector<8x8xf32>
    %154 = tpu.matmul %126, %141, %cst_87 {dimension_numbers = #tpu.dot_dimension_numbers<[1], [1], [0], [0], [0, 0, 1, 0], [], []>} : vector<8x8xf32>, vector<8x8xf32>, vector<8x8xf32> -> vector<8x8xf32>
    %155 = tpu.transpose %138, [1, 0] : vector<8x1xf32> -> vector<1x8xf32>
    %c24_88 = arith.constant 24 : index
    %c0_89 = arith.constant 0 : index
    %156 = vector.load %arg12[%c24_88, %c0_89] : memref<32x8xf32, #tpu.memory_space<vmem>>, vector<8x8xf32>
    %157 = vector.broadcast %155 : vector<1x8xf32> to vector<8x8xf32>
    %158 = arith.mulf %157, %156 : vector<8x8xf32>
    %159 = arith.addf %158, %154 : vector<8x8xf32>
    %c24_90 = arith.constant 24 : index
    %c0_91 = arith.constant 0 : index
    %160 = vector.load %arg12[%c24_90, %c0_91] : memref<32x8xf32, #tpu.memory_space<vmem>>, vector<8x8xf32>
    tpu.vector_store %arg12[%c24_90, %c0_91], %159 {strides = array<i32>} : memref<32x8xf32, #tpu.memory_space<vmem>>, vector<8x8xf32>,
    %c0_i32_92 = arith.constant 0 : i32
    %161 = arith.cmpi eq, %arg2, %c0_i32_92 : i32
    %162 = arith.extui %161 : i1 to i32
    %c0_i32_93 = arith.constant 0 : i32
    %163 = arith.cmpi ne, %162, %c0_i32_93 : i32
    scf.if %163 {
      %c0_94 = arith.constant 0 : index
      %c0_95 = arith.constant 0 : index
      %c0_96 = arith.constant 0 : index
      %164 = vector.load %arg6[%c0_94, %c0_95, %c0_96] : memref<1x1x8xf32, #tpu.memory_space<vmem>>, vector<1x1x8xf32>
      %165 = vector.shape_cast %164 : vector<1x1x8xf32> to vector<1x8xf32>
      %c0_97 = arith.constant 0 : index
      %c0_98 = arith.constant 0 : index
      %c0_99 = arith.constant 0 : index
      %166 = vector.load %arg14[%c0_97, %c0_98, %c0_99] : memref<4x8x1xf32, #tpu.memory_space<vmem>>, vector<1x8x1xf32>
      %167 = vector.shape_cast %166 : vector<1x8x1xf32> to vector<8x1xf32>
      %168 = tpu.reciprocal %167 {approx = true} : vector<8x1xf32> -> vector<8x1xf32>
      %169 = tpu.transpose %168, [1, 0] : vector<8x1xf32> -> vector<1x8xf32>
      %170 = arith.mulf %169, %165 : vector<1x8xf32>
      %c0_100 = arith.constant 0 : index
      %c0_101 = arith.constant 0 : index
      %171 = vector.load %arg12[%c0_100, %c0_101] : memref<32x8xf32, #tpu.memory_space<vmem>>, vector<8x8xf32>
      %172 = vector.broadcast %170 : vector<1x8xf32> to vector<8x8xf32>
      %173 = arith.mulf %171, %172 : vector<8x8xf32>
      %c1_102 = arith.constant 1 : index
      %c0_103 = arith.constant 0 : index
      %c0_104 = arith.constant 0 : index
      %174 = vector.load %arg14[%c1_102, %c0_103, %c0_104] : memref<4x8x1xf32, #tpu.memory_space<vmem>>, vector<1x8x1xf32>
      %175 = vector.shape_cast %174 : vector<1x8x1xf32> to vector<8x1xf32>
      %176 = tpu.reciprocal %175 {approx = true} : vector<8x1xf32> -> vector<8x1xf32>
      %177 = tpu.transpose %176, [1, 0] : vector<8x1xf32> -> vector<1x8xf32>
      %178 = arith.mulf %177, %165 : vector<1x8xf32>
      %c8_105 = arith.constant 8 : index
      %c0_106 = arith.constant 0 : index
      %179 = vector.load %arg12[%c8_105, %c0_106] : memref<32x8xf32, #tpu.memory_space<vmem>>, vector<8x8xf32>
      %180 = vector.broadcast %178 : vector<1x8xf32> to vector<8x8xf32>
      %181 = arith.mulf %179, %180 : vector<8x8xf32>
      %c2_107 = arith.constant 2 : index
      %c0_108 = arith.constant 0 : index
      %c0_109 = arith.constant 0 : index
      %182 = vector.load %arg14[%c2_107, %c0_108, %c0_109] : memref<4x8x1xf32, #tpu.memory_space<vmem>>, vector<1x8x1xf32>
      %183 = vector.shape_cast %182 : vector<1x8x1xf32> to vector<8x1xf32>
      %184 = tpu.reciprocal %183 {approx = true} : vector<8x1xf32> -> vector<8x1xf32>
      %185 = tpu.transpose %184, [1, 0] : vector<8x1xf32> -> vector<1x8xf32>
      %186 = arith.mulf %185, %165 : vector<1x8xf32>
      %c16_110 = arith.constant 16 : index
      %c0_111 = arith.constant 0 : index
      %187 = vector.load %arg12[%c16_110, %c0_111] : memref<32x8xf32, #tpu.memory_space<vmem>>, vector<8x8xf32>
      %188 = vector.broadcast %186 : vector<1x8xf32> to vector<8x8xf32>
      %189 = arith.mulf %187, %188 : vector<8x8xf32>
      %c3_112 = arith.constant 3 : index
      %c0_113 = arith.constant 0 : index
      %c0_114 = arith.constant 0 : index
      %190 = vector.load %arg14[%c3_112, %c0_113, %c0_114] : memref<4x8x1xf32, #tpu.memory_space<vmem>>, vector<1x8x1xf32>
      %191 = vector.shape_cast %190 : vector<1x8x1xf32> to vector<8x1xf32>
      %192 = tpu.reciprocal %191 {approx = true} : vector<8x1xf32> -> vector<8x1xf32>
      %193 = tpu.transpose %192, [1, 0] : vector<8x1xf32> -> vector<1x8xf32>
      %194 = arith.mulf %193, %165 : vector<1x8xf32>
      %c24_115 = arith.constant 24 : index
      %c0_116 = arith.constant 0 : index
      %195 = vector.load %arg12[%c24_115, %c0_116] : memref<32x8xf32, #tpu.memory_space<vmem>>, vector<8x8xf32>
      %196 = vector.broadcast %194 : vector<1x8xf32> to vector<8x8xf32>
      %197 = arith.mulf %195, %196 : vector<8x8xf32>
      %198 = tpu.concatenate %173, %181, %189, %197 in 0 : vector<8x8xf32>, vector<8x8xf32>, vector<8x8xf32>, vector<8x8xf32> -> vector<32x8xf32>
      %c0_117 = arith.constant 0 : index
      %c0_118 = arith.constant 0 : index
      %199 = vector.load %arg9[%c0_117, %c0_118] : memref<32x32xf32, #tpu.memory_space<vmem>>, vector<32x32xf32>
      %cst_119 = arith.constant dense<0.000000e+00> : vector<32x8xf32>
      %200 = tpu.matmul %199, %198, %cst_119 {dimension_numbers = #tpu.dot_dimension_numbers<[1], [0], [0], [1], [0, 0, 1, 1], [], []>} : vector<32x32xf32>, vector<32x8xf32>, vector<32x8xf32> -> vector<32x8xf32>
      %c0_120 = arith.constant 0 : index
      %c0_121 = arith.constant 0 : index
      %c0_122 = arith.constant 0 : index
      %201 = vector.load %arg10[%c0_120, %c0_121, %c0_122] : memref<1x32x8xf32, #tpu.memory_space<vmem>>, vector<1x32x8xf32>
      %202 = vector.shape_cast %201 : vector<1x32x8xf32> to vector<32x8xf32>
      %203 = vector.shape_cast %200 : vector<32x8xf32> to vector<1x32x8xf32>
      tpu.vector_store %arg10[%c0_120, %c0_121, %c0_122], %203 {strides = array<i32>} : memref<1x32x8xf32, #tpu.memory_space<vmem>>, vector<1x32x8xf32>,
    } else {
    }
    return
  }
  func.func @transform_0(%arg0: i32, %arg1: i32, %arg2: i32) -> (i32, i32, i32) {
    %c0_i32 = arith.constant 0 : i32
    %c0_i32_0 = arith.constant 0 : i32
    return %arg0, %c0_i32, %arg1 : i32, i32, i32
  }
  func.func @transform_1(%arg0: i32, %arg1: i32, %arg2: i32) -> (i32, i32, i32) {
    %c0_i32 = arith.constant 0 : i32
    %c0_i32_0 = arith.constant 0 : i32
    return %arg0, %c0_i32, %arg2 : i32, i32, i32
  }
  func.func @transform_2(%arg0: i32, %arg1: i32, %arg2: i32) -> (i32, i32, i32) {
    %c0_i32 = arith.constant 0 : i32
    %c0_i32_0 = arith.constant 0 : i32
    return %arg0, %c0_i32, %arg2 : i32, i32, i32
  }
  func.func @transform_3(%arg0: i32, %arg1: i32, %arg2: i32) -> (i32, i32, i32) {
    %c0_i32 = arith.constant 0 : i32
    %c0_i32_0 = arith.constant 0 : i32
    return %arg0, %c0_i32, %arg1 : i32, i32, i32
  }
  func.func @transform_4(%arg0: i32, %arg1: i32, %arg2: i32) -> (i32, i32) {
    %c0_i32 = arith.constant 0 : i32
    %c0_i32_0 = arith.constant 0 : i32
    %c0_i32_1 = arith.constant 0 : i32
    return %c0_i32, %c0_i32_0 : i32, i32
  }
  func.func @transform_5(%arg0: i32, %arg1: i32, %arg2: i32) -> (i32, i32) {
    %c0_i32 = arith.constant 0 : i32
    %c0_i32_0 = arith.constant 0 : i32
    %c0_i32_1 = arith.constant 0 : i32
    return %c0_i32, %c0_i32_0 : i32, i32
  }
  func.func @transform_6(%arg0: i32, %arg1: i32, %arg2: i32) -> (i32, i32) {
    %c0_i32 = arith.constant 0 : i32
    %c0_i32_0 = arith.constant 0 : i32
    %c0_i32_1 = arith.constant 0 : i32
    return %c0_i32, %c0_i32_0 : i32, i32
  }
  func.func @transform_7(%arg0: i32, %arg1: i32, %arg2: i32) -> (i32, i32, i32) {
    %c0_i32 = arith.constant 0 : i32
    %c0_i32_0 = arith.constant 0 : i32
    return %arg0, %c0_i32, %arg1 : i32, i32, i32
  }
}

</mosaic_0001>

<bundles_post_ra>
// kernel: tpu_custom_call.1
= control target key start
LH: loop header
LB: loop body
LE: loop exit
PB: predicated region body
PF: predicated region fallthrough
CT: control target
= control target key end

     0   :  { %s2286_s24 = smov 0   ;;  %s2288_s25 = smov 0   ;;  %s2537_s0 = inlined_call_operand.vmem [shape: f32[2,32,8], index: 0, kind: input, shape index: {}]   ;;  %s2538_s1 = inlined_call_operand.vmem [shape: f32[2,32,8], index: 1, kind: input, shape index: {}]   ;;  %s2539_s2 = inlined_call_operand.vmem [shape: f32[2,1,8], index: 2, kind: input, shape index: {}]   ;;  %s2540_s3 = inlined_call_operand.vmem [shape: f32[2,1,8], index: 3, kind: input, shape index: {}]   ;;  %s2541_s4 = inlined_call_operand.vmem [shape: f32[32,32], index: 4, kind: input, shape index: {}]   ;;  %s2542_s5 = inlined_call_operand.vmem [shape: f32[64,32], index: 5, kind: input, shape index: {}]   ;;  %s2543_s6 = inlined_call_operand.vmem [shape: f32[32,32], index: 6, kind: input, shape index: {}]   ;;  %s2544_s7 = inlined_call_operand.vmem [shape: f32[2,32,8], index: 7, kind: output, shape index: {}]  }
   0x1   :  { %s2290_s26 = smov 0  }
   0x2 LB: > { %s36_s27 = sadd.s32 1, %s2232_s25  ;;  %p1971_p0 = scmp.ge.s32.totalorder %s2236_s26, 1  ;;  %s2236_s26 = sphi %s2290_s26, %s17_s26   ;;  %s2232_s25 = sphi %s2288_s25, %s2546_s25   ;;  %s2228_s24 = sphi %s2286_s24, %s2545_s24  }
   0x3   : > { %p38_p1 = scmp.ge.s32.totalorder %s36_s27, 2  ;;  %p304_p2 = scmp.lt.s32.totalorder %s2236_s26, 3 }
   0x5   : > { %s2548_s27 = smov (%p38_p1, %s36_s27), 0  ;;  %p305_p3 = pnand %p1971_p0, %p304_p2 }
   0x6   : > { %p362_p4 = scmp.lt.s32.totalorder (!%p305_p3), %s2228_s24, 1  ;;  %v438_v0 = vld [vmem:[%s2541_s4] sm:$0xff] (!%p305_p3)  ;;  %v439_v1 = vld [vmem:[%s2541_s4 + $0x8] sm:$0xff] (!%p305_p3)  ;;  %v440_v2 = vld [vmem:[%s2541_s4 + $0x10] sm:$0xff] (!%p305_p3)  ;;  %v2238_v3 = vmov (!%p305_p3), 0.0|0.0   ;;  %vm2239_vm0 = vmmov (!%p305_p3), 0   ;;  %v752_v31 = vlaneseq (!%p305_p3) }
   0x7   : > { %308 = sbr.rel (%p305_p3) target bundleno = 2420 (0x974), region = 48  ;;  %2134 = vmatprep.subr.bf16.mxu0 (!%p305_p3), %v2238_v3  ;;  %v2135_v4 = vpack.c.bf16 (!%p305_p3), %v439_v1, %v438_v0  ;;  %v441_v5 = vld [vmem:[%s2541_s4 + $0x18] sm:$0xff] (!%p305_p3)  ;;  %v2240_v6 = vmov (!%p305_p3), 0.0   ;;  %vm442_vm1 = vcmask (!%p305_p3), 261120   ;;  %v535_v15 = vld [vmem:[%s2542_s5] sm:$0xff] (!%p305_p3)  ;;  %v536_v18 = vld [vmem:[%s2542_s5 + $0x8] sm:$0xff] (!%p305_p3) }
   0x8   : > { %2057 = vmatprep.mubr.msk.f32.mxu0 (!%p305_p3), %vm2239_vm0, %v2240_v6  ;;  %v2138_v7 = vpack.c.bf16 (!%p305_p3), %v441_v5, %v440_v2  ;;  %2068 = vmatprep.mubr.msk.f32.mxu1 (!%p305_p3), %vm442_vm1, %v535_v15  ;;  %vm526_vm2 = vcmask (!%p305_p3), 64512   ;;  %s2241_s28 = smov (!%p305_p3), 120   ;;  %v537_v26 = vld [vmem:[%s2542_s5 + $0x10] sm:$0xff] (!%p305_p3)  ;;  %v538_v27 = vld [vmem:[%s2542_s5 + $0x18] sm:$0xff] (!%p305_p3)  ;;  %v539_v28 = vld [vmem:[%s2542_s5 + $0x20] sm:$0xff] (!%p305_p3)  ;;  %vm517_vm3 = vcmask (!%p305_p3), 7168  }
   0x9   : > { %2136 = vmatpush3.bf16.msra.mxu0 (!%p305_p3), %v2135_v4  ;;  %527 = vst.msk [vmem:[#allocation3] sm:$0xff] (!%p305_p3), %vm526_vm2, %v2240_v6  ;;  %528 = vst.msk [vmem:[#allocation3 + $0x8] sm:$0xff] (!%p305_p3), %vm526_vm2, %v2240_v6  ;;  %v2242_v29 = vmov (!%p305_p3), -inf   ;;  %v540_v30 = vld [vmem:[%s2542_s5 + $0x28] sm:$0xff] (!%p305_p3)  ;;  %v753_v33 = vshrl.u32 (!%p305_p3), %v752_v31, 7  ;;  %v2243_v44 = vmov (!%p305_p3), 0  }
   0xa   : > { %2137 = vmatprep.subr.bf16.mxu0 (!%p305_p3), %v2238_v3  ;;  %529 = vst.msk [vmem:[#allocation3 + $0x10] sm:$0xff] (!%p305_p3), %vm526_vm2, %v2240_v6  ;;  %530 = vst.msk [vmem:[#allocation3 + $0x18] sm:$0xff] (!%p305_p3), %vm526_vm2, %v2240_v6  ;;  %2188 = vset.pattern.permute.xlu1 (!%p305_p3), %v2243_v44  ;;  %s2244_s18 = smov (!%p305_p3), 112   ;;  %v541_v1 = vld [vmem:[%s2542_s5 + $0x30] sm:$0xff] (!%p305_p3)  ;;  %v542_v5 = vld [vmem:[%s2542_s5 + $0x38] sm:$0xff] (!%p305_p3)  ;;  %s2245_s23 = smov (!%p305_p3), 104  }
   0xb   : > { %518 = vst.msk [vmem:[#allocation4] sm:$0xff] (!%p305_p3), %vm517_vm3, %v2242_v29  ;;  %519 = vst.msk [vmem:[#allocation4 + $0x8] sm:$0xff] (!%p305_p3), %vm517_vm3, %v2242_v29  ;;  %v2395_v35 = vsub.s32 (!%p305_p3), 0, %v753_v33 }
   0xc   : > { %520 = vst.msk [vmem:[#allocation4 + $0x10] sm:$0xff] (!%p305_p3), %vm517_vm3, %v2242_v29  ;;  %521 = vst.msk [vmem:[#allocation4 + $0x18] sm:$0xff] (!%p305_p3), %vm517_vm3, %v2242_v29 }
   0xd   : > { %2139 = vmatpush3.bf16.msra.mxu0 (!%p305_p3), %v2138_v7  ;;  %522 = vst.msk [vmem:[#allocation5] sm:$0xff] (!%p305_p3), %vm517_vm3, %v2240_v6  ;;  %523 = vst.msk [vmem:[#allocation5 + $0x8] sm:$0xff] (!%p305_p3), %vm517_vm3, %v2240_v6 }
   0xe   : > { %s2550_s24 = smov (!%p362_p4, %s2228_s24), 1  ;;  %2080 = vmatprep.subr.mxu0 %v2240_v6  ;;  %524 = vst.msk [vmem:[#allocation5 + $0x10] sm:$0xff] %vm517_vm3, %v2240_v6  ;;  %525 = vst.msk [vmem:[#allocation5 + $0x18] sm:$0xff] %vm517_vm3, %v2240_v6 }
   0xf   : > { %s2321_s13 = sshll.u32 %s2550_s24, 5  ;;  %s383_s17 = scalar_lea.vmem %s2539_s2, %s2550_s24 }
  0x10   : > { %s369_s16 = scalar_lea.vmem %s2537_s0, %s2321_s13  ;;  %s377_s19 = scalar_lea.vmem %s2538_s1, %s2321_s13  ;;  %v673_v32 = vld [vmem:[%s383_s17] sm:$0x1] }
  0x11   : > { %v402_v8 = vld [vmem:[%s369_s16] sm:$0xff]  ;;  %v403_v9 = vld [vmem:[%s369_s16 + $0x8] sm:$0xff]  ;;  %v533_v13 = vld [vmem:[%s377_s19 + $0x10] sm:$0xff]  ;;  %v674_v34 = vsub.f32 1.0, %v673_v32  ;;  %v2398_v37 = vrot.slane %v673_v32, %v2395_v35  ;;  %s389_s9 = scalar_lea.vmem %s2540_s3, %s2550_s24 }
  0x12   : > { %406 = vxpose.xlu0.b32.start [1/4] (short) (narrow) %v402_v8, 8  ;;  %v531_v10 = vld [vmem:[%s377_s19] sm:$0xff]  ;;  %v532_v11 = vld [vmem:[%s377_s19 + $0x8] sm:$0xff]  ;;  %v534_v14 = vld [vmem:[%s377_s19 + $0x18] sm:$0xff] }
  0x13   : > { %v2140_v12 = vpack.c.bf16 %v532_v11, %v531_v10  ;;  %v2144_v16 = vpack.c.bf16 %v534_v14, %v533_v13  ;;  %v404_v17 = vld [vmem:[%s369_s16 + $0x10] sm:$0xff]  ;;  %v405_v19 = vld [vmem:[%s369_s16 + $0x18] sm:$0xff]  ;;  %v675_v36 = vmul.f32 -1e+30, %v674_v34  ;;  %v2406_v45 = vld [vmem:[#allocation4] sm:$0xff] }
  0x14   : > { %v985_v2 = vld [vmem:[#allocation4 + $0x8] sm:$0xff]  ;;  %v1205_v32 = vld [vmem:[#allocation4 + $0x10] sm:$0xff] }
  0x15   : > { %2141 = vmatprep.subr.bf16.mxu1 %v2140_v12  ;;  %v2401_v38 = vrot.slane %v675_v36, %v2395_v35 }
  0x16   : > { %407 = vxpose.xlu0.b32.cont [2/4] (short) (narrow) %v403_v9, 8  ;;  %2143 = vmatpush3.bf16.msra.mxu1 %v2140_v12 }
  0x17   : > { %2145 = vmatprep.subr.bf16.mxu1 %v2144_v16 }
  0x1a   : > { %408 = vxpose.xlu0.b32.cont [3/4] (short) (narrow) %v404_v17, 8  ;;  %2147 = vmatpush3.bf16.msra.mxu1 %v2144_v16 }
  0x1b   : > { %2110 = vmatprep.subr.mxu1 %v2240_v6 }
  0x1d   : > { %2069 = vmatmul.mubr.msk.f32.vlgmr.msra.gmra.mrb[0].mxu1 %vm442_vm1, %v536_v18 }
  0x1e   : > { %409 = vxpose.xlu0.b32.end [4/4] (short) (narrow) %v405_v19, 8  ;;  %2071 = vmatprep.mubr.msk.f32.mxu1 %vm442_vm1, %v537_v26 }
  0x21   : > { %2072 = vmatmul.mubr.msk.f32.gmra.mrb[2].mxu1 %vm442_vm1, %v538_v27 }
  0x22   : > { %2074 = vmatprep.mubr.msk.f32.mxu1 %vm442_vm1, %v539_v28  ;;  %v1425_v28 = vld [vmem:[#allocation4 + $0x18] sm:$0xff] }
  0x25   : > { %2075 = vmatmul.mubr.msk.f32.gmra.mrb[4].mxu1 %vm442_vm1, %v540_v30 }
  0x26   : > { %2077 = vmatprep.mubr.msk.f32.mxu1 %vm442_vm1, %v541_v1 }
  0x29   : > { %2078 = vmatmul.mubr.msk.f32.gmra.mrb[6].mxu1 %vm442_vm1, %v542_v5 }
  0x2a   : > { %2112 = vmatprep.mubr.msk.f32.mxu1 %vm2239_vm0, %v2240_v6 }
  0x47   : > { %2189 = vset.pattern.permute.xlu0 %v2243_v44 }
  0x92   : > { %v422_v20 = vpop.trf.xlu0 }
  0x93   : > { %2058 = vmatmul.mubr.msk.f32.vlgmr.msra.gmra.mrb[0].mxu0 %vm442_vm1, %v422_v20 }
  0x94   : > { %2082 = vmatprep.mubr.msk.f32.mxu0 %vm2239_vm0, %v2240_v6 }
  0xf0   : > { %v2352_v21 = vpop.f32.mrb[0].mxu1 }
  0xf1   : > { %v634_v22 = vpop.f32.mrb[1].mxu1 }
  0xf2   : > { %2081 = vmatpush3.msra.mxu0 %v634_v22 }
  0xf3   : > { %2085 = vmatprep.subr.mxu0 %v2240_v6 }
  0xf4   : > { %v2073_v49 = vpop.f32.mrb[2].mxu1 }
  0xf5   : > { %v644_v50 = vpop.f32.mrb[3].mxu1  ;;  %2111 = vmatpush3.msra.mxu1 %v2073_v49 }
  0xf8   : > { %v2076_v51 = vpop.f32.mrb[4].mxu1 }
  0xf9   : > { %v654_v52 = vpop.f32.mrb[5].mxu1 }
  0xfc   : > { %v2079_v14 = vpop.f32.mrb[6].mxu1 }
  0xfd   : > { %v664_v15 = vpop.f32.mrb[7].mxu1 }
 0x166   : > { %v512_v23 = vpop.f32.mrb[0].mxu0 }
 0x167   : > { %516 = vst.msk [vmem:[#allocation2] sm:$0xff] %vm442_vm1, %v512_v23  ;;  %v2059_v24 = vpop.f32.mrb[1].mxu0 }
 0x16e   : > { %v2356_v25 = vld [vmem:[#allocation2] sm:$0xff] }
 0x16f   : > { %908 = vrot.lane.b32.xlu0 %v2356_v25, %s2241_s28  ;;  %2083 = vmatmul.mubr.msk.f32.vlgmr.msra.gmra.mrb[2].mxu0 %vm526_vm2, %v2356_v25 }
 0x170   : > { %2087 = vmatprep.mubr.msk.f32.mxu0 %vm2239_vm0, %v2240_v6 }
 0x1e1   : > { %v909_v57 = vpop.permute.xlu0 %908 }
 0x242   : > { %v747_v39 = vpop.f32.mrb[2].mxu0 }
 0x243   : > { %v757_v40 = vmul.f32 %v2398_v37, %v747_v39  ;;  %v2084_v41 = vpop.f32.mrb[3].mxu0 }
 0x245   : > { %v764_v42 = vadd.f32 %v2401_v38, %v757_v40 }
 0x247   : > { %v766_v43 = vsel %vm526_vm2, %v764_v42, -inf }
 0x248   : > { %767 = vmax.xlane.f32.xlu1 %v766_v43 }
 0x2d5   : > { %v768_v46 = vpop.xlane.xlu1 %767 }
 0x2d6   : > { %v2409_v47 = vmax.f32 %v2406_v45, %v768_v46 }
 0x2d8   : > { %v770_v48 = vsub.f32 %v2406_v45, %v2409_v47  ;;  %789 = vst.msk [vmem:[#allocation4] sm:$0xff] %vm517_vm3, %v2409_v47  ;;  %775 = vperm.xlu1 %2188, %v2409_v47  }
 0x357   : > { %v776_v53 = vpop.permute.xlu1 %775 }
 0x358   : > { %v778_v54 = vsub.f32 %v764_v42, %v776_v53 }
 0x35a   : > { %v779_v55 = vmul.f32 1.442695, %v778_v54  ;;  %v771_v54 = vmul.f32 1.442695, %v770_v48 }
 0x35c   : > { %2190 = vpow2.f32 %v779_v55  ;;  %v1002_v55 = vld [vmem:[#allocation5 + $0x8] sm:$0xff] }
 0x366   : > { %v2416_v56 = vpop.eup %2190 }
 0x367   : > { %2086 = vmatpush3.xpose.msk.msra.mxu0 %vm526_vm2, %v2416_v56 }
 0x368   : > { %2090 = vmatprep.subr.mxu0 %v2240_v6 }
 0x36a   : > { %2088 = vmatmul.mubr.msk.f32.vlgmr.msra.gmra.mrb[4].mxu0 %vm526_vm2, %v654_v52 }
 0x36b   : > { %2091 = vmatpush3.msra.mxu0 %v2352_v21  ;;  %2092 = vmatprep.mubr.msk.f32.mxu0 %vm2239_vm0, %v2240_v6 }
 0x36c   : > { %2095 = vmatprep.subr.mxu0 %v2240_v6 }
 0x36e   : > { %2093 = vmatmul.mubr.msk.f32.vlgmr.msra.gmra.mrb[6].mxu0 %vm526_vm2, %v909_v57 }
 0x36f   : > { %2097 = vmatprep.mubr.msk.f32.mxu0 %vm2239_vm0, %v2240_v6 }
 0x43d   : > { %v2429_v58 = vpop.f32.mrb[4].mxu0 }
 0x43e   : > { %v2089_v59 = vpop.f32.mrb[5].mxu0 }
 0x441   : > { %v978_v60 = vpop.f32.mrb[6].mxu0 }
 0x442   : > { %v982_v61 = vmul.f32 %v978_v60, %v2398_v37  ;;  %v2094_v62 = vpop.f32.mrb[7].mxu0 }
 0x444   : > { %v983_v63 = vadd.f32 %v982_v61, %v2401_v38  ;;  %v781_v61 = vld [vmem:[#allocation5] sm:$0xff] }
 0x446   : > { %v986_v0 = vsel %vm526_vm2, %v983_v63, -inf }
 0x447   : > { %987 = vmax.xlane.f32.xlu1 %v986_v0 }
 0x458   : > { %1128 = vrot.lane.b32.xlu1 %v2356_v25, %s2244_s18  ;;  %s397_s18 = scalar_lea.vmem %s2544_s7, %s2321_s13 }
 0x4d4   : > { %v988_v3 = vpop.xlane.xlu1 %987 }
 0x4d5   : > { %v989_v4 = vmax.f32 %v985_v2, %v988_v3  ;;  %v1118_v3 = vld [vmem:[#allocation3 + $0x8] sm:$0xff] }
 0x4d7   : > { %v990_v7 = vsub.f32 %v985_v2, %v989_v4  ;;  %1009 = vst.msk [vmem:[#allocation4 + $0x8] sm:$0xff] %vm517_vm3, %v989_v4  ;;  %995 = vperm.xlu0 %2189, %v989_v4  }
 0x4d8   : > { %v1129_v13 = vpop.permute.xlu1 %1128 }
 0x4d9   : > { %v991_v39 = vmul.f32 1.442695, %v990_v7 }
 0x4db   : > { %1348 = vrot.lane.b32.xlu0 %v2356_v25, %s2245_s23 }
 0x556   : > { %v996_v8 = vpop.permute.xlu0 %995 }
 0x557   : > { %v998_v9 = vsub.f32 %v983_v63, %v996_v8 }
 0x559   : > { %v999_v10 = vmul.f32 1.442695, %v998_v9 }
 0x55a   : > { %v1349_v11 = vpop.permute.xlu0 %1348 }
 0x55b   : > { %2192 = vpow2.f32 %v999_v10  ;;  %2113 = vmatmul.mubr.msk.f32.vlgmr.msra.gmra.mrb[8].mxu1 %vm526_vm2, %v1349_v11  ;;  %v1222_v11 = vld [vmem:[#allocation5 + $0x10] sm:$0xff] }
 0x55c   : > { %2194 = vpow2.f32 %v991_v39 }
 0x565   : > { %v2193_v12 = vpop.eup %2192 }
 0x566   : > { %2096 = vmatpush3.xpose.msk.msra.mxu0 %vm526_vm2, %v2193_v12  ;;  %v2195_v40 = vpop.eup %2194 }
 0x567   : > { %2100 = vmatprep.subr.mxu0 %v2240_v6 }
 0x569   : > { %2098 = vmatmul.mubr.msk.f32.vlgmr.msra.gmra.mrb[8].mxu0 %vm526_vm2, %v2076_v51 }
 0x56a   : > { %2101 = vmatpush3.msra.mxu0 %v644_v50  ;;  %2102 = vmatprep.mubr.msk.f32.mxu0 %vm2239_vm0, %v2240_v6 }
 0x56b   : > { %2105 = vmatprep.subr.mxu0 %v2240_v6 }
 0x56d   : > { %2103 = vmatmul.mubr.msk.f32.vlgmr.msra.gmra.mrb[10].mxu0 %vm526_vm2, %v1129_v13 }
 0x56e   : > { %2107 = vmatprep.mubr.msk.f32.mxu0 %vm2239_vm0, %v2240_v6 }
 0x62e   : > { %v1418_v16 = vpop.f32.mrb[8].mxu1 }
 0x62f   : > { %v1422_v17 = vmul.f32 %v1418_v16, %v2398_v37  ;;  %v2114_v18 = vpop.f32.mrb[9].mxu1 }
 0x631   : > { %v1423_v19 = vadd.f32 %v1422_v17, %v2401_v38 }
 0x633   : > { %v1426_v20 = vsel %vm526_vm2, %v1423_v19, -inf }
 0x634   : > { %1427 = vmax.xlane.f32.xlu1 %v1426_v20 }
 0x63c   : > { %v2460_v21 = vpop.f32.mrb[8].mxu0 }
 0x63d   : > { %v2099_v22 = vpop.f32.mrb[9].mxu0 }
 0x640   : > { %v1198_v23 = vpop.f32.mrb[10].mxu0 }
 0x641   : > { %v1202_v24 = vmul.f32 %v1198_v23, %v2398_v37  ;;  %v2104_v25 = vpop.f32.mrb[11].mxu0  ;;  %v1004_v37 = vsel %vm526_vm2, %v2193_v12, 0.0  ;;  %v898_v23 = vld [vmem:[#allocation3] sm:$0xff] }
 0x642   : > { %v1734_v25 = vld [vmem:[%s2543_s6] sm:$0xff] }
 0x643   : > { %v1203_v26 = vadd.f32 %v1202_v24, %v2401_v38  ;;  %v783_v38 = vsel %vm526_vm2, %v2416_v56, 0.0  ;;  %v1003_v56 = vmul.f32 %v2195_v40, %v1002_v55  ;;  %2128 = vmatprep.mubr.msk.f32.mxu1 %vm442_vm1, %v1734_v25 }
 0x645   : > { %v1206_v27 = vsel %vm526_vm2, %v1203_v26, -inf }
 0x646   : > { %1207 = vmax.xlane.f32.xlu0 %v1206_v27 }
 0x6c1   : > { %v1428_v29 = vpop.xlane.xlu1 %1427 }
 0x6c2   : > { %v1429_v30 = vmax.f32 %v1425_v28, %v1428_v29 }
 0x6c4   : > { %v1430_v31 = vsub.f32 %v1425_v28, %v1429_v30  ;;  %1449 = vst.msk [vmem:[#allocation4 + $0x18] sm:$0xff] %vm517_vm3, %v1429_v30  ;;  %1435 = vperm.xlu1 %2188, %v1429_v30   ;;  %v1569_v30 = vld [vmem:[%s389_s9] sm:$0x1] }
 0x6c6   : > { %v1431_v47 = vmul.f32 1.442695, %v1430_v31 }
 0x6d3   : > { %v1208_v33 = vpop.xlane.xlu0 %1207 }
 0x6d4   : > { %v1209_v34 = vmax.f32 %v1205_v32, %v1208_v33 }
 0x6d6   : > { %v1210_v36 = vsub.f32 %v1205_v32, %v1209_v34  ;;  %1229 = vst.msk [vmem:[#allocation4 + $0x10] sm:$0xff] %vm517_vm3, %v1209_v34  ;;  %1215 = vperm.xlu0 %2189, %v1209_v34  }
 0x6d8   : > { %v1211_v45 = vmul.f32 1.442695, %v1210_v36 }
 0x6e8   : > { %1005 = vadd.xlane.f32.xlu1 %v1004_v37 }
 0x6f5   : > { %784 = vadd.xlane.f32.xlu0 %v783_v38 }
 0x71b   : > { %1086 = vxpose.xlu1.b32.start.end [1/1] (short) (narrow) %v2195_v40, 8 }
 0x743   : > { %v1436_v41 = vpop.permute.xlu1 %1435 }
 0x744   : > { %v1438_v42 = vsub.f32 %v1423_v19, %v1436_v41 }
 0x746   : > { %v1439_v46 = vmul.f32 1.442695, %v1438_v42 }
 0x755   : > { %v1216_v43 = vpop.permute.xlu0 %1215 }
 0x756   : > { %v1218_v44 = vsub.f32 %v1203_v26, %v1216_v43 }
 0x758   : > { %v1219_v49 = vmul.f32 1.442695, %v1218_v44  ;;  %v1338_v44 = vld [vmem:[#allocation3 + $0x10] sm:$0xff] }
 0x75a   : > { %2196 = vpow2.f32 %v1219_v49 }
 0x75b   : > { %2198 = vpow2.f32 %v1439_v46 }
 0x75c   : > { %2200 = vpow2.f32 %v771_v54 }
 0x764   : > { %v2197_v50 = vpop.eup %2196 }
 0x765   : > { %2106 = vmatpush3.xpose.msk.msra.mxu0 %vm526_vm2, %v2197_v50  ;;  %v1224_v51 = vsel %vm526_vm2, %v2197_v50, 0.0  ;;  %v2199_v52 = vpop.eup %2198  ;;  %v1558_v50 = vld [vmem:[#allocation3 + $0x18] sm:$0xff] }
 0x766   : > { %1225 = vadd.xlane.f32.xlu0 %v1224_v51  ;;  %2115 = vmatprep.subr.mxu0 %v2240_v6  ;;  %v1444_v53 = vsel %vm526_vm2, %v2199_v52, 0.0  ;;  %v2201_v60 = vpop.eup %2200 }
 0x767   : > { %v782_v63 = vmul.f32 %v2201_v60, %v781_v61 }
 0x768   : > { %2108 = vmatmul.mubr.msk.f32.vlgmr.msra.gmra.mrb[12].mxu0 %vm526_vm2, %v664_v15 }
 0x769   : > { %2116 = vmatpush3.xpose.msk.msra.mxu0 %vm526_vm2, %v2199_v52  ;;  %2117 = vmatprep.mubr.msk.f32.mxu0 %vm2239_vm0, %v2240_v6 }
 0x76a   : > { %1445 = vadd.xlane.f32.xlu0 %v1444_v53 }
 0x76c   : > { %2118 = vmatmul.mubr.msk.f32.vlgmr.msra.gmra.mrb[14].mxu0 %vm526_vm2, %v2079_v14  ;;  %v1442_v14 = vld [vmem:[#allocation5 + $0x18] sm:$0xff] }
 0x775   : > { %v1006_v57 = vpop.xlane.xlu1 %1005 }
 0x776   : > { %v1007_v59 = vadd.f32 %v1006_v57, %v1003_v56 }
 0x778   : > { %1008 = vst.msk [vmem:[#allocation5 + $0x8] sm:$0xff] %vm517_vm3, %v1007_v59 }
 0x77f   : > { %v1611_v62 = vld [vmem:[#allocation5 + $0x8] sm:$0xff] }
 0x780   : > { %2202 = vrcp.f32 %v1611_v62 }
 0x781   : > { %2204 = vpow2.f32 %v1211_v45 }
 0x782   : > { %v785_v6 = vpop.xlane.xlu0 %784  ;;  %2206 = vpow2.f32 %v1431_v47 }
 0x783   : > { %v786_v0 = vadd.f32 %v785_v6, %v782_v63 }
 0x785   : > { %788 = vst.msk [vmem:[#allocation5] sm:$0xff] %vm517_vm3, %v786_v0 }
 0x78a   : > { %v2203_v1 = vpop.eup %2202 }
 0x78b   : > { %1613 = vxpose.xlu1.b32.start.end [1/1] (short) (narrow) %v2203_v1, 8  ;;  %v2205_v2 = vpop.eup %2204 }
 0x78c   : > { %v1570_v48 = vld [vmem:[#allocation5] sm:$0xff]  ;;  %v2207_v7 = vpop.eup %2206  ;;  %v1223_v12 = vmul.f32 %v2205_v2, %v1222_v11 }
 0x78d   : > { %2208 = vrcp.f32 %v1570_v48  ;;  %v1443_v16 = vmul.f32 %v2207_v7, %v1442_v14 }
 0x797   : > { %866 = vxpose.xlu0.b32.start.end [1/1] (short) (narrow) %v2201_v60, 8  ;;  %v2209_v10 = vpop.eup %2208 }
 0x79b   : > { %v1102_v4 = vpop.trf.xlu1  ;;  %1306 = vxpose.xlu0.b32.start.end [1/1] (short) (narrow) %v2205_v2, 8  ;;  %v1735_v2 = vld [vmem:[%s2543_s6 + $0x8] sm:$0xff] }
 0x79c   : > { %v1122_v5 = vrot.slane %v1102_v4, %v2395_v35 }
 0x79e   : > { %v1123_v8 = vmul.f32 %v1122_v5, %v1118_v3  ;;  %v1736_v3 = vld [vmem:[%s2543_s6 + $0x10] sm:$0xff] }
 0x79f   : > { %1526 = vxpose.xlu0.b32.start.end [1/1] (short) (narrow) %v2207_v7, 8 }
 0x7a0   : > { %v1124_v9 = vadd.f32 %v1123_v8, %v2460_v21 }
 0x7a2   : > { %1125 = vst.msk [vmem:[#allocation3 + $0x8] sm:$0xff] %vm526_vm2, %v1124_v9 }
 0x7a3   : > { %1572 = vxpose.xlu0.b32.start.end [1/1] (short) (narrow) %v2209_v10, 8 }
 0x7a9   : > { %v1646_v39 = vld [vmem:[#allocation3 + $0x8] sm:$0xff] }
 0x7f3   : > { %v1226_v13 = vpop.xlane.xlu0 %1225 }
 0x7f4   : > { %v1227_v15 = vadd.f32 %v1226_v13, %v1223_v12 }
 0x7f6   : > { %1228 = vst.msk [vmem:[#allocation5 + $0x10] sm:$0xff] %vm517_vm3, %v1227_v15 }
 0x7f7   : > { %v1446_v17 = vpop.xlane.xlu0 %1445 }
 0x7f8   : > { %v1447_v18 = vadd.f32 %v1446_v17, %v1443_v16 }
 0x7fa   : > { %1448 = vst.msk [vmem:[#allocation5 + $0x18] sm:$0xff] %vm517_vm3, %v1447_v18 }
 0x7fd   : > { %v1652_v19 = vld [vmem:[#allocation5 + $0x10] sm:$0xff] }
 0x7fe   : > { %2210 = vrcp.f32 %v1652_v19 }
 0x801   : > { %v1693_v20 = vld [vmem:[#allocation5 + $0x18] sm:$0xff] }
 0x802   : > { %2212 = vrcp.f32 %v1693_v20 }
 0x808   : > { %v2211_v21 = vpop.eup %2210 }
 0x809   : > { %1654 = vxpose.xlu0.b32.start.end [1/1] (short) (narrow) %v2211_v21, 8 }
 0x80b   : > { %v1629_v31 = vpop.trf.xlu1 }
 0x80c   : > { %v2213_v22 = vpop.eup %2212  ;;  %v1645_v33 = vmul.f32 %v1629_v31, %v1569_v30 }
 0x80d   : > { %1695 = vxpose.xlu1.b32.start.end [1/1] (short) (narrow) %v2213_v22, 8 }
 0x80e   : > { %v1650_v36 = vrot.slane %v1645_v33, %v2395_v35 }
 0x810   : > { %v1651_v41 = vmul.f32 %v1650_v36, %v1646_v39 }
 0x817   : > { %v882_v24 = vpop.trf.xlu0 }
 0x818   : > { %v902_v26 = vrot.slane %v882_v24, %v2395_v35 }
 0x81a   : > { %v903_v27 = vmul.f32 %v902_v26, %v898_v23 }
 0x81b   : > { %v1322_v28 = vpop.trf.xlu0 }
 0x81c   : > { %v904_v29 = vadd.f32 %v903_v27, %v2429_v58  ;;  %v1342_v58 = vrot.slane %v1322_v28, %v2395_v35 }
 0x81e   : > { %905 = vst.msk [vmem:[#allocation3] sm:$0xff] %vm526_vm2, %v904_v29  ;;  %v1343_v49 = vmul.f32 %v1342_v58, %v1338_v44 }
 0x81f   : > { %v1542_v32 = vpop.trf.xlu0 }
 0x820   : > { %v1562_v46 = vrot.slane %v1542_v32, %v2395_v35 }
 0x822   : > { %v1563_v54 = vmul.f32 %v1562_v46, %v1558_v50 }
 0x823   : > { %v1588_v34 = vpop.trf.xlu0 }
 0x824   : > { %v1604_v37 = vmul.f32 %v1588_v34, %v1569_v30 }
 0x825   : > { %v1605_v40 = vld [vmem:[#allocation3] sm:$0xff] }
 0x826   : > { %v1609_v38 = vrot.slane %v1604_v37, %v2395_v35 }
 0x828   : > { %v1610_v42 = vmul.f32 %v1609_v38, %v1605_v40 }
 0x82a   : > { %v2148_v43 = vpack.c.bf16 %v1651_v41, %v1610_v42 }
 0x82c   : > { %2149 = vmatprep.subr.bf16.mxu1 %v2148_v43 }
 0x82d   : > { %2151 = vmatpush3.bf16.msra.mxu1 %v2148_v43 }
 0x83b   : > { %v1302_v51 = vpop.f32.mrb[12].mxu0 }
 0x83c   : > { %v1344_v52 = vadd.f32 %v1343_v49, %v1302_v51  ;;  %v2109_v53 = vpop.f32.mrb[13].mxu0 }
 0x83e   : > { %1345 = vst.msk [vmem:[#allocation3 + $0x10] sm:$0xff] %vm526_vm2, %v1344_v52 }
 0x83f   : > { %v1522_v55 = vpop.f32.mrb[14].mxu0 }
 0x840   : > { %v1564_v56 = vadd.f32 %v1563_v54, %v1522_v55  ;;  %v2119_v57 = vpop.f32.mrb[15].mxu0 }
 0x842   : > { %1565 = vst.msk [vmem:[#allocation3 + $0x18] sm:$0xff] %vm526_vm2, %v1564_v56 }
 0x845   : > { %v1687_v0 = vld [vmem:[#allocation3 + $0x10] sm:$0xff] }
 0x849   : > { %v1728_v1 = vld [vmem:[#allocation3 + $0x18] sm:$0xff] }
 0x889   : > { %v1670_v59 = vpop.trf.xlu0 }
 0x88a   : > { %v1686_v60 = vmul.f32 %v1670_v59, %v1569_v30 }
 0x88c   : > { %v1691_v62 = vrot.slane %v1686_v60, %v2395_v35 }
 0x88d   : > { %v1711_v61 = vpop.trf.xlu1 }
 0x88e   : > { %v1727_v63 = vmul.f32 %v1711_v61, %v1569_v30  ;;  %v1692_v45 = vmul.f32 %v1691_v62, %v1687_v0 }
 0x890   : > { %v1732_v6 = vrot.slane %v1727_v63, %v2395_v35  ;;  %v1737_v35 = vld [vmem:[%s2543_s6 + $0x18] sm:$0xff] }
 0x892   : > { %v1733_v47 = vmul.f32 %v1732_v6, %v1728_v1 }
 0x894   : > { %v2152_v48 = vpack.c.bf16 %v1733_v47, %v1692_v45 }
 0x896   : > { %2153 = vmatprep.subr.bf16.mxu1 %v2152_v48 }
 0x897   : > { %2155 = vmatpush3.bf16.msra.mxu1 %v2152_v48 }
 0x89a   : > { %2129 = vmatmul.mubr.msk.f32.vlgmr.msra.gmra.mrb[10].mxu1 %vm442_vm1, %v1735_v2 }
 0x89b   : > { %2131 = vmatprep.mubr.msk.f32.mxu1 %vm442_vm1, %v1736_v3 }
 0x89e   : > { %2132 = vmatmul.mubr.msk.f32.gmra.mrb[12].mxu1 %vm442_vm1, %v1737_v35 }
 0x96d   : > { %v2130_v4 = vpop.f32.mrb[10].mxu1 }
 0x96e   : > { %1836 = vst.msk [vmem:[%s397_s18 + $0x8] sm:$0xff] %vm526_vm2, %v2130_v4  ;;  %v1816_v5 = vpop.f32.mrb[11].mxu1 }
 0x96f   : > { %1835 = vst.msk [vmem:[%s397_s18] sm:$0xff] %vm526_vm2, %v1816_v5 }
 0x971   : > { %v2133_v7 = vpop.f32.mrb[12].mxu1 }
 0x972   : > { %1838 = vst.msk [vmem:[%s397_s18 + $0x18] sm:$0xff] %vm526_vm2, %v2133_v7  ;;  %v1826_v8 = vpop.f32.mrb[13].mxu1 }
 0x973   : > { %1837 = vst.msk [vmem:[%s397_s18 + $0x10] sm:$0xff] %vm526_vm2, %v1826_v8 }
 0x974 PF: > { %s17_s26 = sadd.s32 1, %s2236_s26   ;;  %s2545_s24 = smov %s2232_s25 }
 0x975   : > { %p14_p5 = scmp.ge.s32.totalorder %s17_s26, 4   ;;  %s2546_s25 = smov %s2548_s27 }
 0x977   :  { %16 = sbr.rel (!%p14_p5) target bundleno = 2 (0x2), region = 101 }

</bundles_post_ra>
